<compile_context>
chip_gen: v5e
topology: v5e:2x2
jax: 0.10.0
libtpu: 0.0.40
codegen_flags: <defaults>
</compile_context>

<pallas_src>
import functools
import math

import jax
import jax.numpy as jnp
from jax.experimental import pallas as pl
from jax.experimental.pallas import tpu as pltpu


def _round_up(x, m):
    return ((x + m - 1) // m) * m


def _round_down(x, m):
    return (x // m) * m


# ---------------------------------------------------------------------------
# Kernels
# ---------------------------------------------------------------------------
def _mean_full_kernel(x_ref, o_ref, *, inv_t):
    """x_ref: (bn, T, D) tile (full T); o_ref: (bn, D)."""
    s = jnp.sum(x_ref[...].astype(jnp.float32), axis=1)
    o_ref[...] = (s * inv_t).astype(o_ref.dtype)


def _mean_tiled_kernel(x_ref, o_ref, acc_ref, *, inv_t, tk, t_total):
    """x_ref: (bn, tk, D) tile; o_ref: (bn, D); acc_ref: (bn, D) f32 scratch."""
    k = pl.program_id(1)

    @pl.when(k == 0)
    def _():
        acc_ref[...] = jnp.zeros_like(acc_ref)

    x = x_ref[...].astype(jnp.float32)
    rem = t_total % tk
    if rem:
        # Last segment block is a boundary block: mask the (undefined) padded
        # rows so they do not leak into the valid accumulator rows.
        last = pl.num_programs(1) - 1
        limit = jnp.where(k == last, rem, tk)
        seg = jax.lax.broadcasted_iota(jnp.int32, x.shape, 1)
        x = jnp.where(seg < limit, x, 0.0)

    acc_ref[...] += jnp.sum(x, axis=1)

    @pl.when(k == pl.num_programs(1) - 1)
    def _():
        o_ref[...] = (acc_ref[...] * inv_t).astype(o_ref.dtype)


# ---------------------------------------------------------------------------
# Tile planning (VMEM-footprint aware)
# ---------------------------------------------------------------------------
def _plan_tiles(n, t, d, in_itemsize, out_itemsize, budget_bytes, max_raw_bytes):
    """Return (bn, tk).  tk == t means the single-pass (no scratch) path."""
    sub = max(8, 32 // in_itemsize)          # sublane multiple of the input dtype
    lane = _round_up(d, 128)                  # lane-padded feature width

    def in_vmem(bn, tk):                      # layout-padded bytes of ONE buffer
        return bn * _round_up(tk, sub) * lane * in_itemsize

    def out_vmem(bn):
        return _round_up(bn, 8) * lane * out_itemsize

    def acc_vmem(bn):
        return _round_up(bn, 8) * lane * 4

    bn0 = min(n, 8)
    single_pass_fits = (2 * in_vmem(bn0, t) + 2 * out_vmem(bn0)) <= budget_bytes

    if single_pass_fits:
        row_raw = max(t * d * in_itemsize, 1)
        row_vmem = _round_up(t, sub) * lane * in_itemsize
        bn_cap = min(
            max_raw_bytes // row_raw,
            budget_bytes // max(2 * row_vmem + 2 * lane * out_itemsize, 1),
        )
        bn = min(_round_up(n, 8), _round_down(max(bn_cap, 8), 8))
        if n >= 16:
            # Keep >= 2 blocks on the parallel batch axis (v7x has 2 TCs).
            bn = min(bn, _round_up((n + 1) // 2, 8))
        if bn >= n:
            bn = n                            # one block covers all rows exactly
        else:
            bn = max(8, _round_down(bn, 8))
        return bn, t

    # ---- huge T*D: tile the segment (reduction) axis too ----
    bn = bn0
    fixed = 2 * out_vmem(bn) + acc_vmem(bn)
    per_seg = bn * lane * in_itemsize
    tk_cap_vmem = max(budget_bytes - fixed, 0) // max(2 * per_seg, 1)
    tk_cap_raw = max_raw_bytes // max(bn * d * in_itemsize, 1)
    tk = max(sub, _round_down(min(tk_cap_vmem, tk_cap_raw), sub))
    tk = min(tk, t)
    return bn, tk


# ---------------------------------------------------------------------------
# Wrapper
# ---------------------------------------------------------------------------
def simple_consensus_avg(x, *, max_block_bytes=8 << 20):
    """Mean over dim=1 with keepdim=True (SimpleConsensus 'avg' forward)."""
    assert x.ndim >= 2, "consensus dim=1 requires rank >= 2"
    n, t = x.shape[0], x.shape[1]
    rest = x.shape[2:]
    d = math.prod(rest) if rest else 1

    orig_dtype = x.dtype
    in_itemsize = jnp.dtype(orig_dtype).itemsize
    x3 = x.reshape(n, t, d)

    # Lane folding: if D is not a multiple of 128, fold the smallest factor r of
    # T that makes r*D lane-dense (free contiguous reshape).  The kernel then
    # reduces over T/r, and a tiny XLA sum over r finishes the job.
    r = 1
    if d % 128 != 0 and t > 1:
        r0 = 128 // math.gcd(d, 128)
        if r0 > 1 and t % r0 == 0 and t // r0 >= 2:
            r = r0
    t_eff, d_eff = t // r, d * r
    if r > 1:
        x3 = x3.reshape(n, t_eff, d_eff)

    out_dtype = jnp.float32 if r > 1 else orig_dtype
    out_itemsize = jnp.dtype(out_dtype).itemsize

    # Generation-aware VMEM budget.
    try:
        cap = int(getattr(pltpu.get_tpu_info(), "vmem_capacity_bytes", 64 << 20))
    except Exception:
        cap = 64 << 20                        # conservative fallback (v7x-sized)
    vmem_limit = min(cap * 3 // 4, 64 << 20)  # 64 MiB on v5e/v6e, 48 MiB on v7x
    budget = max(vmem_limit - (8 << 20), 12 << 20)

    bn, tk = _plan_tiles(n, t_eff, d_eff, in_itemsize, out_itemsize,
                         budget, max_block_bytes)
    single_pass = tk >= t_eff
    inv_t = 1.0 / float(t)

    compiler_params = pltpu.CompilerParams(
        dimension_semantics=("parallel",) if single_pass else ("parallel", "arbitrary"),
        vmem_limit_bytes=int(vmem_limit),
    )

    if single_pass:
        kernel = functools.partial(_mean_full_kernel, inv_t=inv_t)
        out2d = pl.pallas_call(
            kernel,
            out_shape=jax.ShapeDtypeStruct((n, d_eff), out_dtype),
            grid=(pl.cdiv(n, bn),),
            in_specs=[pl.BlockSpec((bn, t_eff, d_eff), lambda i: (i, 0, 0))],
            out_specs=pl.BlockSpec((bn, d_eff), lambda i: (i, 0)),
            compiler_params=compiler_params,
        )(x3)
    else:
        kernel = functools.partial(_mean_tiled_kernel, inv_t=inv_t,
                                   tk=tk, t_total=t_eff)
        out2d = pl.pallas_call(
            kernel,
            out_shape=jax.ShapeDtypeStruct((n, d_eff), out_dtype),
            grid=(pl.cdiv(n, bn), pl.cdiv(t_eff, tk)),
            in_specs=[pl.BlockSpec((bn, tk, d_eff), lambda i, k: (i, k, 0))],
            out_specs=pl.BlockSpec((bn, d_eff), lambda i, k: (i, 0)),
            scratch_shapes=[pltpu.VMEM((bn, d_eff), jnp.float32)],
            compiler_params=compiler_params,
        )(x3)

    if r > 1:
        # Finish the r-way lane fold on the tiny output (T/r smaller than input).
        out = out2d.reshape(n, r, d).sum(axis=1).astype(orig_dtype)
    else:
        out = out2d
    return out.reshape((n, 1) + rest)


if __name__ == "__main__":
    # SimpleConsensus has no parameters (init_weights is a no-op).
    key = jax.random.PRNGKey(0)

    # batch=2, segments=8 (consensus dim=1), hidden=32 -> lane-folded path.
    x = jax.random.normal(key, (2, 8, 32), dtype=jnp.float32)
    out = jax.block_until_ready(simple_consensus_avg(x))
    ref = jnp.mean(x, axis=1, keepdims=True)
    assert out.shape == (2, 1, 32), out.shape
    assert out.dtype == x.dtype
    assert jnp.allclose(out, ref, atol=1e-5, rtol=1e-5)

    # Ragged N (not a multiple of 8), bf16, D=160 (lane fold r=4), no padding.
    x2 = jax.random.normal(jax.random.PRNGKey(1), (10, 12, 160), dtype=jnp.bfloat16)
    out2 = jax.block_until_ready(simple_consensus_avg(x2))
    ref2 = jnp.mean(x2.astype(jnp.float32), axis=1, keepdims=True).astype(jnp.bfloat16)
    assert out2.shape == (10, 1, 160), out2.shape
    assert out2.dtype == x2.dtype
    assert jnp.allclose(out2.astype(jnp.float32), ref2.astype(jnp.float32),
                        atol=2e-2, rtol=2e-2)

    # D already a multiple of 128 (no fold), N not a multiple of 8.
    x3 = jax.random.normal(jax.random.PRNGKey(2), (9, 5, 256), dtype=jnp.float32)
    out3 = jax.block_until_ready(simple_consensus_avg(x3))
    ref3 = jnp.mean(x3, axis=1, keepdims=True)
    assert out3.shape == (9, 1, 256), out3.shape
    assert jnp.allclose(out3, ref3, atol=1e-5, rtol=1e-5)

    print("KERNEL_OK")
</pallas_src>

<mosaic_0001>
module attributes {stable_mosaic.version = 11 : i64} {
  func.func @_mean_full_kernel(%arg0: i32, %arg1: memref<2x2x128xf32, #tpu.memory_space<vmem>>, %arg2: memref<2x128xf32, #tpu.memory_space<vmem>>) attributes {dimension_semantics = [#tpu.dimension_semantics<parallel>], iteration_bounds = array<i64: 1>, scalar_prefetch = 0 : i64, scratch_operands = 0 : i64, tpu.core_type = #tpu.core_type<tc>, window_params = [{transform_indices = @transform_0, window_bounds = array<i64: 2, 2, 128>}, {transform_indices = @transform_1, window_bounds = array<i64: 2, 128>}]} {
    %c0 = arith.constant 0 : index
    %c0_0 = arith.constant 0 : index
    %c0_1 = arith.constant 0 : index
    %0 = vector.load %arg1[%c0, %c0_0, %c0_1] : memref<2x2x128xf32, #tpu.memory_space<vmem>>, vector<2x2x128xf32>
    %cst = arith.constant dense<0.000000e+00> : vector<2x128xf32>
    %1 = vector.multi_reduction <add>, %0, %cst [1] : vector<2x2x128xf32> to vector<2x128xf32>
    %cst_2 = arith.constant 1.250000e-01 : f32
    %2 = vector.broadcast %cst_2 : f32 to vector<2x128xf32>
    %3 = arith.mulf %1, %2 : vector<2x128xf32>
    %c0_3 = arith.constant 0 : index
    %c0_4 = arith.constant 0 : index
    %4 = vector.load %arg2[%c0_3, %c0_4] : memref<2x128xf32, #tpu.memory_space<vmem>>, vector<2x128xf32>
    tpu.vector_store %arg2[%c0_3, %c0_4], %3 {strides = array<i32>} : memref<2x128xf32, #tpu.memory_space<vmem>>, vector<2x128xf32>,
    return
  }
  func.func @transform_0(%arg0: i32) -> (i32, i32, i32) {
    %c0_i32 = arith.constant 0 : i32
    %c0_i32_0 = arith.constant 0 : i32
    %c0_i32_1 = arith.constant 0 : i32
    return %arg0, %c0_i32, %c0_i32_0 : i32, i32, i32
  }
  func.func @transform_1(%arg0: i32) -> (i32, i32) {
    %c0_i32 = arith.constant 0 : i32
    %c0_i32_0 = arith.constant 0 : i32
    return %arg0, %c0_i32 : i32, i32
  }
}

</mosaic_0001>

<bundles_post_ra>
// kernel: tpu_custom_call.1
= control target key start
LH: loop header
LB: loop body
LE: loop exit
PB: predicated region body
PF: predicated region fallthrough
CT: control target
= control target key end

     0   :  { %6 = vsyncpa [#allocation3], 0  ;;  %s143_s0 = inlined_call_operand.hbm [shape: f32[2,2,128], index: 0, kind: input, shape index: {}]   ;;  %s144_s1 = inlined_call_operand.hbm [shape: f32[2,128], index: 1, kind: output, shape index: {}]  }
   0x1   :  { %7 = vsyncpa [#allocation4], 0  ;;  %s12_s8 = sshll.u32 %s143_s0, 4  ;;  %s123_s9 = smov [#allocation2]   ;;  %s13_s8 = int_to_ptr.hbm [resolvable:$true] %s12_s8 }
   0x2   :  { %s14_s10 = sshll.u32 %s123_s9, 4  ;;  %s124_s11 = smov 32   ;;  %s15_s10 = int_to_ptr.vmem [resolvable:$true] %s14_s10 }
   0x3   :  { %s125_s12 = smov 2  }
   0x4   :  { %20 = dma.hbm_to_vmem [thread:$0]  %s13_s8, 64, %s15_s10, [#allocation3], %s124_s11, %s124_s11, %s125_s12  }
   0x5   :  { %119 = dma.done.wait [#allocation3], 64  }
   0x6   :  { %120 = vsyncadd [#allocation3], 4294967232  ;;  %vm27_vm0 = vcmask 1041408   ;;  %v25_v0 = vld [vmem:[#allocation2] sm:$0x3]  ;;  %s126_s0 = smov [#allocation5]  }
   0x7   :  { %v26_v1 = vld [vmem:[#allocation2 + $0x2] sm:$0x3]  ;;  %v28_v2 = vsel %vm27_vm0, %v25_v0, 0.0  ;;  %s55_s13 = sshll.u32 %s126_s0, 4  ;;  %s57_s16 = sshll.u32 %s144_s1, 4  ;;  %vm46_vm1 = vcmask 1041409   ;;  %s56_s13 = int_to_ptr.vmem [resolvable:$true] %s55_s13  ;;  %s58_s16 = int_to_ptr.hbm [resolvable:$true] %s57_s16 }
   0x8   :  { %v35_v3 = vsel %vm27_vm0, %v26_v1, 0.0  ;;  %v29_v4 = vrot.slane %v28_v2, 4 }
   0x9   :  { %v36_v5 = vrot.slane %v35_v3, 4 }
   0xa   :  { %v30_v6 = vadd.f32 %v29_v4, %v28_v2 }
   0xb   :  { %v37_v7 = vadd.f32 %v36_v5, %v35_v3 }
   0xc   :  { %v31_v8 = vrot.slane %v30_v6, 2 }
   0xd   :  { %v38_v9 = vrot.slane %v37_v7, 2 }
   0xe   :  { %v32_v10 = vadd.f32 %v31_v8, %v30_v6 }
   0xf   :  { %v39_v11 = vadd.f32 %v38_v9, %v37_v7 }
  0x10   :  { %v33_v12 = vrot.slane %v32_v10, 1 }
  0x11   :  { %v40_v13 = vrot.slane %v39_v11, 1 }
  0x12   :  { %v34_v14 = vadd.f32 %v33_v12, %v32_v10 }
  0x13   :  { %v41_v15 = vadd.f32 %v40_v13, %v39_v11 }
  0x14   :  { %v42_v16 = vmul.f32 0.125, %v34_v14 }
  0x15   :  { %v43_v17 = vmul.f32 0.125, %v41_v15 }
  0x17   :  { %v47_v18 = vsel %vm46_vm1, %v43_v17, %v42_v16 }
  0x18   :  { %49 = vst [vmem:[#allocation5] sm:$0x3] %v47_v18 }
  0x19   :  { %60 = dma.vmem_to_hbm [thread:$0]  %s56_s13, 32, %s58_s16, [#allocation4]  }
  0x1a   :  { %121 = dma.done.wait [#allocation4], 32  }
  0x1b   :  { %122 = vsyncadd [#allocation4], 4294967264 }
  0x1c   :  { %65 = vsyncpa [#allocation3], 1 }
  0x1d   :  { %66 = vsyncpa [#allocation4], 1 }

</bundles_post_ra>
